<compile_context>
chip_gen: v6e
topology: v6e:2x2x1
jax: 0.10.0
libtpu: 0.0.40
codegen_flags: <defaults>
</compile_context>

<pallas_src>
import jax
import jax.numpy as jnp
from jax.experimental import pallas as pl
from jax.experimental.pallas import tpu as pltpu


# ----------------------------------------------------------------------------
# Kernel 1: fused conditioning (gamma/beta/word-attention), whole batch at once.
# ----------------------------------------------------------------------------
def _cond_kernel(cond_ref,        # (B*L, D+1)  words (rows) with ones column
                 w1_ref,          # (D+1, F1)   fused first layer (bias folded)
                 w2_ref,          # (F1, F2)    fused block-diag second layer
                 b2_ref,          # (1, F2)     fused second-layer bias row
                 vmask_ref,       # (B*L, 1)    1.0 if word valid else 0.0
                 smat_ref,        # (B, B*L)    batch-segment selection matrix
                 gmat_ref,        # (B*L, B*L)  same-batch membership matrix
                 geff_ref,        # (B, C)      out: effective scale
                 beff_ref,        # (B, C)      out: effective shift
                 attn_ref):       # (B*L, 1)    out: attention weights
    C = geff_ref.shape[1]

    # Two fused matmuls cover all three MLPs.
    h = jnp.dot(cond_ref[...], w1_ref[...], preferred_element_type=jnp.float32)
    h = jnp.maximum(h, 0.0)                                   # shared ReLU
    o2 = jnp.dot(h, w2_ref[...],
                 preferred_element_type=jnp.float32) + b2_ref[...]   # (BL, F2)

    # Word-attention: sigmoid logits, masked softmax over each batch's words.
    # logits are in (0, 1) so the softmax needs no max-subtraction; masked
    # words contribute exactly 0 (multiply by the validity mask).
    logit = jax.nn.sigmoid(o2[:, 2 * C:])                     # (BL, 1)
    num = jnp.exp(logit) * vmask_ref[...]                     # (BL, 1)
    den = jnp.dot(gmat_ref[...], num,
                  preferred_element_type=jnp.float32)         # per-row segment sum
    attn = num / den                                          # (BL, 1)
    attn_ref[...] = attn

    # Attention-weighted per-batch reduction over words:
    #   sum_l attn_l * (gamma_l * x + beta_l) = g_eff * x + b_eff
    gb = jnp.dot(smat_ref[...], attn * o2[:, :2 * C],
                 preferred_element_type=jnp.float32)          # (B, 2C)
    geff_ref[...] = gb[:, :C]
    beff_ref[...] = gb[:, C:]


# ----------------------------------------------------------------------------
# Kernel 2: streaming affine over the feature map (the only heavy data path).
# ----------------------------------------------------------------------------
def _affine_stream_kernel(g_ref, b_ref, x_ref, o_ref):
    # g/b: (Bt, C, 1) f32; x/o: (Bt, C, HWt) in the caller's dtype.
    x = x_ref[...].astype(jnp.float32)
    o_ref[...] = (g_ref[...] * x + b_ref[...]).astype(o_ref.dtype)


# ----------------------------------------------------------------------------
# Host wrapper.
# ----------------------------------------------------------------------------
def affine_word(params, x, w, mask):
    """Forward pass of Affine_word.

    x:    (B, C, H, W) NCHW feature map, C == num_features (any float dtype)
    w:    (B, cond_dim, L) word embeddings (module input `y`)
    mask: (B,) int32 number of valid words per batch element
    Returns (out NCHW in x.dtype, re_weight (B, L, 1) f32).
    """
    B, C, H, W = x.shape
    HW = H * W
    D, L = w.shape[1], w.shape[2]
    BL = B * L
    f32 = jnp.float32

    wg1, bg1 = params['gamma']['l1']
    wg2, bg2 = params['gamma']['l2']
    wb1, bb1 = params['beta']['l1']
    wb2, bb2 = params['beta']['l2']
    ww1, bw1 = params['words']['l1']
    ww2, bw2 = params['words']['l2']
    Dh = ww1.shape[0]
    F1 = 2 * C + Dh          # stacked first-layer output width
    F2 = 2 * C + 1           # stacked second-layer output width

    # ---- fused conditioning parameters (tiny, built once per call) ---------
    # First layer: rows [wg1|bg1 ; wb1|bb1 ; ww1|bw1], transposed -> (D+1, F1).
    w1_rows = jnp.concatenate([
        jnp.concatenate([wg1, bg1[:, None]], axis=1),
        jnp.concatenate([wb1, bb1[:, None]], axis=1),
        jnp.concatenate([ww1, bw1[:, None]], axis=1)], axis=0).astype(f32)
    W1t = w1_rows.T                                            # (D+1, F1)
    # Second layer: block-diagonal [wg2, wb2, ww2], transposed -> (F1, F2).
    W2 = jnp.zeros((F2, F1), f32)
    W2 = W2.at[:C, :C].set(wg2.astype(f32))
    W2 = W2.at[C:2 * C, C:2 * C].set(wb2.astype(f32))
    W2 = W2.at[2 * C:, 2 * C:].set(ww2.astype(f32))
    W2t = W2.T                                                 # (F1, F2)
    b2row = jnp.concatenate([bg2, bb2, bw2]).reshape(1, F2).astype(f32)

    # Words as (B*L, D) rows, augmented with a ones column (bias folding).
    cond = jnp.transpose(w, (0, 2, 1)).reshape(BL, D).astype(f32)
    cond_aug = jnp.concatenate([cond, jnp.ones((BL, 1), f32)], axis=1)

    # Word-validity mask + batch-segment selection / membership matrices.
    vmask = (jnp.arange(L)[None, :] < mask[:, None]).reshape(BL, 1).astype(f32)
    seg = jnp.arange(BL) // L
    S = (seg[None, :] == jnp.arange(B)[:, None]).astype(f32)   # (B, BL)
    G = (seg[None, :] == seg[:, None]).astype(f32)             # (BL, BL)

    def fullspec(shape):
        return pl.BlockSpec(shape, lambda i: (0,) * len(shape))

    geff, beff, attn = pl.pallas_call(
        _cond_kernel,
        out_shape=(jax.ShapeDtypeStruct((B, C), f32),
                   jax.ShapeDtypeStruct((B, C), f32),
                   jax.ShapeDtypeStruct((BL, 1), f32)),
        grid=(1,),
        in_specs=[fullspec((BL, D + 1)), fullspec((D + 1, F1)),
                  fullspec((F1, F2)), fullspec((1, F2)),
                  fullspec((BL, 1)), fullspec((B, BL)), fullspec((BL, BL))],
        out_specs=(fullspec((B, C)), fullspec((B, C)), fullspec((BL, 1))),
        compiler_params=pltpu.CompilerParams(
            dimension_semantics=("arbitrary",)),
    )(cond_aug, W1t, W2t, b2row, vmask, S, G)

    # ---- streaming affine ----------------------------------------------------
    g3 = geff[:, :, None]                   # (B, C, 1) f32
    b3 = beff[:, :, None]
    x3 = x.reshape(B, C, HW)                # native dtype; no host-side cast

    # Tile the lane axis only when the map is large; keep lanes >= 128.
    HWt = HW if HW <= 2048 else 2048
    itemsize = jnp.dtype(x.dtype).itemsize
    per_batch_bytes = C * HWt * itemsize
    Bt = int(max(1, min(B, (4 * 1024 * 1024) // max(per_batch_bytes, 1))))

    out3 = pl.pallas_call(
        _affine_stream_kernel,
        out_shape=jax.ShapeDtypeStruct((B, C, HW), x.dtype),
        grid=(pl.cdiv(B, Bt), pl.cdiv(HW, HWt)),
        in_specs=[pl.BlockSpec((Bt, C, 1), lambda bi, ti: (bi, 0, 0)),
                  pl.BlockSpec((Bt, C, 1), lambda bi, ti: (bi, 0, 0)),
                  pl.BlockSpec((Bt, C, HWt), lambda bi, ti: (bi, 0, ti))],
        out_specs=pl.BlockSpec((Bt, C, HWt), lambda bi, ti: (bi, 0, ti)),
        compiler_params=pltpu.CompilerParams(
            dimension_semantics=("parallel", "parallel"),
            vmem_limit_bytes=48 * 1024 * 1024),
    )(g3, b3, x3)

    out = out3.reshape(B, C, H, W)
    re_weight = attn.reshape(B, L, 1)
    return out, re_weight


# ----------------------------------------------------------------------------
# Parameter init (shapes from the module's __init__).  Random values are used
# instead of the module's zero-init so the numerical check is non-trivial.
# ----------------------------------------------------------------------------
def _init_linear(key, d_out, d_in, scale=0.1):
    kw, kb = jax.random.split(key)
    return (scale * jax.random.normal(kw, (d_out, d_in), jnp.float32),
            scale * jax.random.normal(kb, (d_out,), jnp.float32))


def init_params(key, cond_dim, num_features):
    ks = jax.random.split(key, 6)
    return {
        'gamma': {'l1': _init_linear(ks[0], num_features, cond_dim),
                  'l2': _init_linear(ks[1], num_features, num_features)},
        'beta':  {'l1': _init_linear(ks[2], num_features, cond_dim),
                  'l2': _init_linear(ks[3], num_features, num_features)},
        'words': {'l1': _init_linear(ks[4], cond_dim // 2, cond_dim),
                  'l2': _init_linear(ks[5], 1, cond_dim // 2)},
    }


# ----------------------------------------------------------------------------
# Pure-JAX reference (literal transcription of the PyTorch forward,
# small-spatial branch; the large-spatial branch is mathematically identical).
# ----------------------------------------------------------------------------
def _mlp_ref(p, x):
    w1, b1 = p['l1']
    w2, b2 = p['l2']
    h = jax.nn.relu(jnp.dot(x, w1.T) + b1)
    return jnp.dot(h, w2.T) + b2


def reference_forward(params, x, w, mask):
    cond = jnp.transpose(w, (0, 2, 1))                        # (B, L, D)
    gamma = _mlp_ref(params['gamma'], cond)                   # (B, L, C)
    beta = _mlp_ref(params['beta'], cond)                     # (B, L, C)
    logit = jax.nn.sigmoid(_mlp_ref(params['words'], cond))   # (B, L, 1)
    L = cond.shape[1]
    valid = jnp.arange(L)[None, :, None] < mask[:, None, None]
    logit = jnp.where(valid, logit, -jnp.inf)
    attn = jax.nn.softmax(logit, axis=1)                      # (B, L, 1)
    out = jnp.sum(attn[..., None, None] *
                  (gamma[..., None, None] * x[:, None] + beta[..., None, None]),
                  axis=1)
    return out, attn


# ----------------------------------------------------------------------------
if __name__ == "__main__":
    key = jax.random.PRNGKey(0)
    B, cond_dim, num_features, L, H, W = 2, 32, 16, 8, 16, 16

    kp, kx, kw_ = jax.random.split(key, 3)
    params = init_params(kp, cond_dim, num_features)
    x = jax.random.normal(kx, (B, num_features, H, W), jnp.float32)   # NCHW
    w = jax.random.normal(kw_, (B, cond_dim, L), jnp.float32)         # words
    mask = jnp.array([5, 8], dtype=jnp.int32)                         # valid words

    out, attn = affine_word(params, x, w, mask)
    out = jax.block_until_ready(out)

    ref_out, ref_attn = reference_forward(params, x, w, mask)
    ref_out = jax.block_until_ready(ref_out)

    assert out.shape == (B, num_features, H, W), out.shape
    assert attn.shape == (B, L, 1), attn.shape
    max_err = float(jnp.max(jnp.abs(out - ref_out)))
    max_err_attn = float(jnp.max(jnp.abs(attn - ref_attn)))
    assert max_err < 1e-4, f"output mismatch vs reference: {max_err}"
    assert max_err_attn < 1e-5, f"attn mismatch vs reference: {max_err_attn}"

    # bf16 I/O path (halves HBM traffic on the streaming affine); conditioning
    # stays f32, compute inside the kernel is f32 -> loose tolerance only
    # reflects bf16 storage of x / out.
    out_bf, attn_bf = affine_word(params, x.astype(jnp.bfloat16), w, mask)
    out_bf = jax.block_until_ready(out_bf)
    max_err_bf = float(jnp.max(jnp.abs(out_bf.astype(jnp.float32) - ref_out)))
    assert max_err_bf < 5e-2, f"bf16 output mismatch vs reference: {max_err_bf}"

    print("KERNEL_OK")
</pallas_src>

<mosaic_0001>
module attributes {stable_mosaic.version = 11 : i64} {
  func.func @_cond_kernel(%arg0: i32, %arg1: memref<16x33xf32, #tpu.memory_space<vmem>>, %arg2: memref<33x48xf32, #tpu.memory_space<vmem>>, %arg3: memref<48x33xf32, #tpu.memory_space<vmem>>, %arg4: memref<1x33xf32, #tpu.memory_space<vmem>>, %arg5: memref<16x1xf32, #tpu.memory_space<vmem>>, %arg6: memref<2x16xf32, #tpu.memory_space<vmem>>, %arg7: memref<16x16xf32, #tpu.memory_space<vmem>>, %arg8: memref<2x16xf32, #tpu.memory_space<vmem>>, %arg9: memref<2x16xf32, #tpu.memory_space<vmem>>, %arg10: memref<16x1xf32, #tpu.memory_space<vmem>>) attributes {dimension_semantics = [#tpu.dimension_semantics<arbitrary>], iteration_bounds = array<i64: 1>, scalar_prefetch = 0 : i64, scratch_operands = 0 : i64, tpu.core_type = #tpu.core_type<tc>, window_params = [{pipeline_mode = #tpu.pipeline_mode<synchronous>, transform_indices = @transform_0, window_bounds = array<i64: 16, 33>}, {pipeline_mode = #tpu.pipeline_mode<synchronous>, transform_indices = @transform_1, window_bounds = array<i64: 33, 48>}, {pipeline_mode = #tpu.pipeline_mode<synchronous>, transform_indices = @transform_2, window_bounds = array<i64: 48, 33>}, {pipeline_mode = #tpu.pipeline_mode<synchronous>, transform_indices = @transform_3, window_bounds = array<i64: 1, 33>}, {pipeline_mode = #tpu.pipeline_mode<synchronous>, transform_indices = @transform_4, window_bounds = array<i64: 16, 1>}, {pipeline_mode = #tpu.pipeline_mode<synchronous>, transform_indices = @transform_5, window_bounds = array<i64: 2, 16>}, {pipeline_mode = #tpu.pipeline_mode<synchronous>, transform_indices = @transform_6, window_bounds = array<i64: 16, 16>}, {pipeline_mode = #tpu.pipeline_mode<synchronous>, transform_indices = @transform_7, window_bounds = array<i64: 2, 16>}, {pipeline_mode = #tpu.pipeline_mode<synchronous>, transform_indices = @transform_8, window_bounds = array<i64: 2, 16>}, {pipeline_mode = #tpu.pipeline_mode<synchronous>, transform_indices = @transform_9, window_bounds = array<i64: 16, 1>}]} {
    %c0 = arith.constant 0 : index
    %c0_0 = arith.constant 0 : index
    %0 = vector.load %arg1[%c0, %c0_0] : memref<16x33xf32, #tpu.memory_space<vmem>>, vector<16x33xf32>
    %c0_1 = arith.constant 0 : index
    %c0_2 = arith.constant 0 : index
    %1 = vector.load %arg2[%c0_1, %c0_2] : memref<33x48xf32, #tpu.memory_space<vmem>>, vector<33x48xf32>
    %cst = arith.constant dense<0.000000e+00> : vector<16x48xf32>
    %2 = tpu.matmul %0, %1, %cst {dimension_numbers = #tpu.dot_dimension_numbers<[1], [0], [0], [1], [0, 0, 1, 1], [], []>} : vector<16x33xf32>, vector<33x48xf32>, vector<16x48xf32> -> vector<16x48xf32>
    %cst_3 = arith.constant 0.000000e+00 : f32
    %3 = vector.broadcast %cst_3 : f32 to vector<16x48xf32>
    %4 = arith.maximumf %2, %3 : vector<16x48xf32>
    %c0_4 = arith.constant 0 : index
    %c0_5 = arith.constant 0 : index
    %5 = vector.load %arg3[%c0_4, %c0_5] : memref<48x33xf32, #tpu.memory_space<vmem>>, vector<48x33xf32>
    %cst_6 = arith.constant dense<0.000000e+00> : vector<16x33xf32>
    %6 = tpu.matmul %4, %5, %cst_6 {dimension_numbers = #tpu.dot_dimension_numbers<[1], [0], [0], [1], [0, 0, 1, 1], [], []>} : vector<16x48xf32>, vector<48x33xf32>, vector<16x33xf32> -> vector<16x33xf32>
    %c0_7 = arith.constant 0 : index
    %c0_8 = arith.constant 0 : index
    %7 = vector.load %arg4[%c0_7, %c0_8] : memref<1x33xf32, #tpu.memory_space<vmem>>, vector<1x33xf32>
    %8 = vector.broadcast %7 : vector<1x33xf32> to vector<16x33xf32>
    %9 = arith.addf %6, %8 : vector<16x33xf32>
    %10 = vector.extract_strided_slice %9 {offsets = [0, 32], sizes = [16, 1], strides = [1, 1]} : vector<16x33xf32> to vector<16x1xf32>
    %11 = arith.negf %10 : vector<16x1xf32>
    %12 = math.exp %11 : vector<16x1xf32>
    %cst_9 = arith.constant 1.000000e+00 : f32
    %13 = vector.broadcast %cst_9 : f32 to vector<16x1xf32>
    %14 = arith.addf %13, %12 : vector<16x1xf32>
    %15 = arith.divf %13, %14 : vector<16x1xf32>
    %16 = math.exp %15 : vector<16x1xf32>
    %c0_10 = arith.constant 0 : index
    %c0_11 = arith.constant 0 : index
    %17 = vector.load %arg5[%c0_10, %c0_11] : memref<16x1xf32, #tpu.memory_space<vmem>>, vector<16x1xf32>
    %18 = arith.mulf %16, %17 : vector<16x1xf32>
    %c0_12 = arith.constant 0 : index
    %c0_13 = arith.constant 0 : index
    %19 = vector.load %arg7[%c0_12, %c0_13] : memref<16x16xf32, #tpu.memory_space<vmem>>, vector<16x16xf32>
    %cst_14 = arith.constant dense<0.000000e+00> : vector<16x1xf32>
    %20 = tpu.matmul %19, %18, %cst_14 {dimension_numbers = #tpu.dot_dimension_numbers<[1], [0], [0], [1], [0, 0, 1, 1], [], []>} : vector<16x16xf32>, vector<16x1xf32>, vector<16x1xf32> -> vector<16x1xf32>
    %21 = arith.divf %18, %20 : vector<16x1xf32>
    %c0_15 = arith.constant 0 : index
    %c0_16 = arith.constant 0 : index
    %22 = vector.load %arg10[%c0_15, %c0_16] : memref<16x1xf32, #tpu.memory_space<vmem>>, vector<16x1xf32>
    tpu.vector_store %arg10[%c0_15, %c0_16], %21 {strides = array<i32>} : memref<16x1xf32, #tpu.memory_space<vmem>>, vector<16x1xf32>,
    %c0_17 = arith.constant 0 : index
    %c0_18 = arith.constant 0 : index
    %23 = vector.load %arg6[%c0_17, %c0_18] : memref<2x16xf32, #tpu.memory_space<vmem>>, vector<2x16xf32>
    %24 = vector.extract_strided_slice %9 {offsets = [0, 0], sizes = [16, 32], strides = [1, 1]} : vector<16x33xf32> to vector<16x32xf32>
    %25 = vector.broadcast %21 : vector<16x1xf32> to vector<16x32xf32>
    %26 = arith.mulf %25, %24 : vector<16x32xf32>
    %cst_19 = arith.constant dense<0.000000e+00> : vector<2x32xf32>
    %27 = tpu.matmul %23, %26, %cst_19 {dimension_numbers = #tpu.dot_dimension_numbers<[1], [0], [0], [1], [0, 0, 1, 1], [], []>} : vector<2x16xf32>, vector<16x32xf32>, vector<2x32xf32> -> vector<2x32xf32>
    %28 = vector.extract_strided_slice %27 {offsets = [0, 0], sizes = [2, 16], strides = [1, 1]} : vector<2x32xf32> to vector<2x16xf32>
    %c0_20 = arith.constant 0 : index
    %c0_21 = arith.constant 0 : index
    %29 = vector.load %arg8[%c0_20, %c0_21] : memref<2x16xf32, #tpu.memory_space<vmem>>, vector<2x16xf32>
    tpu.vector_store %arg8[%c0_20, %c0_21], %28 {strides = array<i32>} : memref<2x16xf32, #tpu.memory_space<vmem>>, vector<2x16xf32>,
    %30 = vector.extract_strided_slice %27 {offsets = [0, 16], sizes = [2, 16], strides = [1, 1]} : vector<2x32xf32> to vector<2x16xf32>
    %c0_22 = arith.constant 0 : index
    %c0_23 = arith.constant 0 : index
    %31 = vector.load %arg9[%c0_22, %c0_23] : memref<2x16xf32, #tpu.memory_space<vmem>>, vector<2x16xf32>
    tpu.vector_store %arg9[%c0_22, %c0_23], %30 {strides = array<i32>} : memref<2x16xf32, #tpu.memory_space<vmem>>, vector<2x16xf32>,
    return
  }
  func.func @transform_0(%arg0: i32) -> (i32, i32) {
    %c0_i32 = arith.constant 0 : i32
    %c0_i32_0 = arith.constant 0 : i32
    %c0_i32_1 = arith.constant 0 : i32
    return %c0_i32, %c0_i32_0 : i32, i32
  }
  func.func @transform_1(%arg0: i32) -> (i32, i32) {
    %c0_i32 = arith.constant 0 : i32
    %c0_i32_0 = arith.constant 0 : i32
    %c0_i32_1 = arith.constant 0 : i32
    return %c0_i32, %c0_i32_0 : i32, i32
  }
  func.func @transform_2(%arg0: i32) -> (i32, i32) {
    %c0_i32 = arith.constant 0 : i32
    %c0_i32_0 = arith.constant 0 : i32
    %c0_i32_1 = arith.constant 0 : i32
    return %c0_i32, %c0_i32_0 : i32, i32
  }
  func.func @transform_3(%arg0: i32) -> (i32, i32) {
    %c0_i32 = arith.constant 0 : i32
    %c0_i32_0 = arith.constant 0 : i32
    %c0_i32_1 = arith.constant 0 : i32
    return %c0_i32, %c0_i32_0 : i32, i32
  }
  func.func @transform_4(%arg0: i32) -> (i32, i32) {
    %c0_i32 = arith.constant 0 : i32
    %c0_i32_0 = arith.constant 0 : i32
    %c0_i32_1 = arith.constant 0 : i32
    return %c0_i32, %c0_i32_0 : i32, i32
  }
  func.func @transform_5(%arg0: i32) -> (i32, i32) {
    %c0_i32 = arith.constant 0 : i32
    %c0_i32_0 = arith.constant 0 : i32
    %c0_i32_1 = arith.constant 0 : i32
    return %c0_i32, %c0_i32_0 : i32, i32
  }
  func.func @transform_6(%arg0: i32) -> (i32, i32) {
    %c0_i32 = arith.constant 0 : i32
    %c0_i32_0 = arith.constant 0 : i32
    %c0_i32_1 = arith.constant 0 : i32
    return %c0_i32, %c0_i32_0 : i32, i32
  }
  func.func @transform_7(%arg0: i32) -> (i32, i32) {
    %c0_i32 = arith.constant 0 : i32
    %c0_i32_0 = arith.constant 0 : i32
    %c0_i32_1 = arith.constant 0 : i32
    return %c0_i32, %c0_i32_0 : i32, i32
  }
  func.func @transform_8(%arg0: i32) -> (i32, i32) {
    %c0_i32 = arith.constant 0 : i32
    %c0_i32_0 = arith.constant 0 : i32
    %c0_i32_1 = arith.constant 0 : i32
    return %c0_i32, %c0_i32_0 : i32, i32
  }
  func.func @transform_9(%arg0: i32) -> (i32, i32) {
    %c0_i32 = arith.constant 0 : i32
    %c0_i32_0 = arith.constant 0 : i32
    %c0_i32_1 = arith.constant 0 : i32
    return %c0_i32, %c0_i32_0 : i32, i32
  }
}

</mosaic_0001>

<bundles_post_ra>
// kernel: tpu_custom_call.1
= control target key start
LH: loop header
LB: loop body
LE: loop exit
PB: predicated region body
PF: predicated region fallthrough
CT: control target
= control target key end

     0   :  { %15 = vsyncpa [#allocation3], 0  ;;  %vm45_vm0 = vcmask 1040384   ;;  %vm38_vm1 = vcmask 269312   ;;  %s776_s0 = inlined_call_operand.vmem [shape: f32[16,33], index: 0, kind: input, shape index: {}]   ;;  %s777_s1 = inlined_call_operand.vmem [shape: f32[33,48], index: 1, kind: input, shape index: {}]   ;;  %s778_s2 = inlined_call_operand.vmem [shape: f32[48,33], index: 2, kind: input, shape index: {}]   ;;  %s779_s3 = inlined_call_operand.vmem [shape: f32[1,33], index: 3, kind: input, shape index: {}]   ;;  %s780_s4 = inlined_call_operand.vmem [shape: f32[16,1], index: 4, kind: input, shape index: {}]   ;;  %s781_s5 = inlined_call_operand.vmem [shape: f32[2,16], index: 5, kind: input, shape index: {}]   ;;  %s782_s6 = inlined_call_operand.vmem [shape: f32[16,16], index: 6, kind: input, shape index: {}]   ;;  %s783_s7 = inlined_call_operand.hbm [shape: f32[2,16], index: 7, kind: output, shape index: {0}]   ;;  %s784_s8 = inlined_call_operand.hbm [shape: f32[2,16], index: 8, kind: output, shape index: {1}]   ;;  %s785_s9 = inlined_call_operand.vmem [shape: f32[16,1], index: 9, kind: output, shape index: {2}]  }
   0x1   :  { %v37_v0 = vld [vmem:[%s777_s1 + $0x20] sm:$0x1]  ;;  %v36_v1 = vld [vmem:[%s777_s1 + $0x18] sm:$0xff]  ;;  %v35_v3 = vld [vmem:[%s777_s1 + $0x10] sm:$0xff] }
   0x2   :  { %520 = vmatprep.subr.msk.mxu0 %vm45_vm0, %v37_v0  ;;  %v31_v2 = vld [vmem:[%s776_s0] sm:$0xff]  ;;  %v131_v4 = vld [vmem:[%s778_s2 + $0x28] sm:$0xff] }
   0x3   :  { %521 = vmatpush3.msk.msra.mxu0 %vm45_vm0, %v37_v0  ;;  %530 = vmatprep.mubr.msk.f32.mxu0 %vm38_vm1, %v31_v2  ;;  %v130_v5 = vld [vmem:[%s778_s2 + $0x20] sm:$0xff] }
   0x4   :  { %522 = vmatprep.subr.mxu0 %v36_v1  ;;  %533 = vmatprep.subr.mxu1 %v131_v4 }
   0x5   :  { %16 = vsyncpa [#allocation5], 0  ;;  %523 = vmatpush3.msra.mxu0 %v36_v1  ;;  %v34_v6 = vld [vmem:[%s777_s1 + $0x8] sm:$0xff]  ;;  %534 = vmatpush3.msra.mxu1 %v131_v4  ;;  %v129_v7 = vld [vmem:[%s778_s2 + $0x18] sm:$0xff]  ;;  %s632_s14 = smov 32   ;;  %vm139_vm2 = vcmask 392192  }
   0x6   :  { %524 = vmatprep.subr.mxu0 %v35_v3  ;;  %535 = vmatprep.subr.mxu1 %v130_v5  ;;  %v33_v8 = vld [vmem:[%s777_s1] sm:$0xff]  ;;  %v32_v9 = vld [vmem:[%s776_s0 + $0x8] sm:$0xff]  ;;  %v128_v10 = vld [vmem:[%s778_s2 + $0x10] sm:$0xff]  ;;  %vm259_vm3 = vcmask 130048   ;;  %s633_s18 = smov 96   ;;  %v634_v44 = vmov 32  }
   0x7   :  { %525 = vmatpush3.msra.mxu0 %v35_v3  ;;  %536 = vmatpush3.msra.mxu1 %v130_v5  ;;  %v127_v11 = vld [vmem:[%s778_s2 + $0x8] sm:$0xff]  ;;  %v126_v12 = vld [vmem:[%s778_s2] sm:$0xff]  ;;  %v635_v50 = vmov 0.0   ;;  %vm636_vm4 = vmmov 0   ;;  %vm361_vm5 = vcmask 7168   ;;  %s637_s24 = smov [#allocation2]  }
   0x8   :  { %526 = vmatprep.subr.mxu0 %v34_v6  ;;  %537 = vmatprep.subr.mxu1 %v129_v7  ;;  %v238_v13 = vld [vmem:[%s780_s4 + $0x8] sm:$0xff]  ;;  %v237_v14 = vld [vmem:[%s780_s4] sm:$0xff]  ;;  %s461_s25 = sshll.u32 %s637_s24, 4  ;;  %vm448_vm6 = vcmask 123904   ;;  %s638_s26 = smov 112   ;;  %s462_s25 = int_to_ptr.vmem [resolvable:$true] %s461_s25 }
   0x9   :  { %527 = vmatpush3.msra.mxu0 %v34_v6  ;;  %538 = vmatpush3.msra.mxu1 %v129_v7  ;;  %v490_v19 = vld [vmem:[%s779_s3] ss:$0 sm:$0xff]  ;;  %v250_v43 = vld [vmem:[%s782_s6 + $0x8] sm:$0xff]  ;;  %p593_p1 = scmp.lt.s32.totalorder %s462_s25, %s462_s25 }
   0xa   :  { %528 = vmatprep.subr.mxu0 %v33_v8  ;;  %539 = vmatprep.subr.mxu1 %v128_v10  ;;  %v249_v34 = vld [vmem:[%s782_s6] sm:$0xff] }
   0xb   :  { %529 = vmatpush3.msra.mxu0 %v33_v8  ;;  %540 = vmatpush3.msra.mxu1 %v128_v10  ;;  %v364_v58 = vld [vmem:[%s781_s5] sm:$0x3]  ;;  %s588_s5 = scalar_lea.vmem %s462_s25, 32 }
   0xc   :  { %531 = vmatmul.mubr.msk.f32.vlgmr.msra.gmra.mxu0 %vm38_vm1, %v32_v9  ;;  %541 = vmatprep.subr.mxu1 %v127_v11  ;;  %p589_p0 = scmp.ne.s32.totalorder %s462_s25, %s588_s5  ;;  %p594_p2 = scmp.lt.s32.totalorder %s588_s5, %s588_s5 }
   0xd   :  { %542 = vmatpush3.msra.mxu1 %v127_v11  ;;  %243 = vrot.lane.b32.xlu0 %v238_v13, %s632_s14 }
   0xe   :  { %543 = vmatprep.subr.mxu1 %v126_v12  ;;  %552 = vmatprep.mubr.msk.f32.mxu0 %vm259_vm3, %v249_v34  ;;  %p595_p3 = por %p594_p2, %p593_p1 }
   0xf   :  { %544 = vmatpush3.msra.mxu1 %v126_v12  ;;  %570 = vset.pattern.permute.xlu0 %v634_v44 }
  0x10   :  { %571 = vset.pattern.permute.xlu1 %v634_v44  ;;  %555 = vmatprep.subr.mxu1 %v635_v50  ;;  %p596_p4 = pnand %p595_p3, %p589_p0 }
  0x11   :  { %241 = vrot.lane.b32.xlu0 %v237_v14, %s632_s14 }
  0x7f   :  { %v244_v35 = vpop.permute.xlu0 %243 }
  0x83   :  { %v242_v39 = vpop.permute.xlu0 %241 }
  0xcc   :  { %v532_v15 = vpop.f32.mrf.mxu0 }
  0xcd   :  { %v125_v18 = vmax.f32 %v532_v15, 0.0 }
  0xce   :  { %v115_v16 = vpop.f32.mrf.mxu0 }
  0xcf   :  { %v124_v17 = vmax.f32 %v115_v16, 0.0 }
  0xd1   :  { %545 = vmatprep.mubr.msk.f32.mxu1 %vm139_vm2, %v124_v17 }
  0xd2   :  { %546 = vmatmul.mubr.msk.f32.vlgmr.msra.gmra.mxu1 %vm139_vm2, %v125_v18 }
  0xd3   :  { %559 = vmatprep.mubr.msk.f32.mxu1 %vm636_vm4, %v635_v50 }
 0x192   :  { %v547_v20 = vpop.f32.mrf.mxu1 }
 0x193   :  { %v218_v21 = vadd.f32 %v547_v20, %v490_v19 }
 0x194   :  { %v212_v22 = vpop.f32.mrf.mxu1 }
 0x195   :  { %v494_v23 = vmul.f32 -1.442695, %v218_v21  ;;  %v213_v24 = vadd.f32 %v490_v19, %v212_v22 }
 0x197   :  { %572 = vpow2.f32 %v494_v23  ;;  %v493_v25 = vmul.f32 -1.442695, %v213_v24 }
 0x199   :  { %574 = vpow2.f32 %v493_v25 }
 0x1a4   :  { %v573_v26 = vpop.eup %572 }
 0x1a5   :  { %v228_v27 = vadd.f32 1.0, %v573_v26 }
 0x1a6   :  { %v575_v28 = vpop.eup %574 }
 0x1a7   :  { %576 = vrcp.f32 %v228_v27  ;;  %v227_v29 = vadd.f32 1.0, %v575_v28 }
 0x1a9   :  { %578 = vrcp.f32 %v227_v29 }
 0x1b4   :  { %v577_v30 = vpop.eup %576 }
 0x1b5   :  { %v235_v31 = vmul.f32 1.442695, %v577_v30 }
 0x1b6   :  { %v579_v32 = vpop.eup %578 }
 0x1b7   :  { %580 = vpow2.f32 %v235_v31  ;;  %v233_v33 = vmul.f32 1.442695, %v579_v32 }
 0x1b9   :  { %582 = vpow2.f32 %v233_v33 }
 0x1c4   :  { %v581_v36 = vpop.eup %580 }
 0x1c5   :  { %v248_v37 = vmul.f32 %v581_v36, %v244_v35 }
 0x1c6   :  { %v583_v38 = vpop.eup %582 }
 0x1c7   :  { %255 = vrot.lane.b32.xlu1 %v248_v37, %s633_s18  ;;  %v247_v40 = vmul.f32 %v583_v38, %v242_v39 }
 0x1cb   :  { %253 = vrot.lane.b32.xlu1 %v247_v40, %s633_s18 }
 0x239   :  { %v256_v41 = vpop.permute.xlu1 %255 }
 0x23a   :  { %548 = vmatprep.subr.mxu0 %v256_v41 }
 0x23b   :  { %549 = vmatpush3.msra.mxu0 %v256_v41 }
 0x23d   :  { %v254_v42 = vpop.permute.xlu1 %253 }
 0x23e   :  { %550 = vmatprep.subr.mxu0 %v254_v42 }
 0x23f   :  { %551 = vmatpush3.msra.mxu0 %v254_v42 }
 0x240   :  { %553 = vmatmul.mubr.msk.f32.vlgmr.msra.gmra.mxu0 %vm259_vm3, %v250_v43 }
 0x300   :  { %v554_v45 = vpop.f32.mrf.mxu0 }
 0x301   :  { %345 = vrot.lane.b32.xlu0 %v554_v45, %s632_s14 }
 0x302   :  { %v332_v46 = vpop.f32.mrf.mxu0 }
 0x303   :  { %343 = vrot.lane.b32.xlu1 %v332_v46, %s632_s14 }
 0x373   :  { %v346_v47 = vpop.permute.xlu0 %345 }
 0x374   :  { %584 = vrcp.f32 %v346_v47 }
 0x375   :  { %v344_v48 = vpop.permute.xlu1 %343 }
 0x376   :  { %586 = vrcp.f32 %v344_v48 }
 0x381   :  { %v585_v49 = vpop.eup %584 }
 0x382   :  { %v352_v51 = vmul.f32 %v585_v49, %v248_v37 }
 0x383   :  { %v587_v52 = vpop.eup %586 }
 0x384   :  { %370 = vperm.xlu0 %570, %v352_v51   ;;  %v350_v53 = vmul.f32 %v587_v52, %v247_v40 }
 0x386   :  { %366 = vperm.xlu1 %571, %v350_v53  }
 0x388   :  { %355 = vrot.lane.b32.xlu0 %v350_v53, %s633_s18 }
 0x3ff   :  { %v371_v54 = vpop.permute.xlu0 %370 }
 0x400   :  { %v374_v55 = vmul.f32 %v371_v54, %v218_v21 }
 0x401   :  { %v367_v56 = vpop.permute.xlu1 %366 }
 0x402   :  { %v373_v57 = vmul.f32 %v367_v56, %v213_v24  ;;  %556 = vmatpush3.msra.mxu1 %v374_v55 }
 0x403   :  { %557 = vmatprep.subr.mxu1 %v635_v50  ;;  %v356_v59 = vpop.permute.xlu0 %355 }
 0x404   :  { %362 = vst.msk [vmem:[%s785_s9] sm:$0xff] %vm361_vm5, %v356_v59  ;;  %558 = vmatpush3.msra.mxu1 %v373_v57 }
 0x405   :  { %560 = vmatmul.mubr.msk.f32.vlgmr.msra.gmra.mxu1 %vm259_vm3, %v364_v58 }
 0x4c5   :  { %v444_v60 = vpop.f32.mrf.mxu1 }
 0x4c6   :  { %451 = vrot.lane.b32.xlu1 %v444_v60, %s638_s26  ;;  %449 = vst.msk [vmem:[#allocation2] sm:$0x3] %vm448_vm6, %v444_v60 }
 0x4c7   :  { %v561_v61 = vpop.f32.mrf.mxu1 }
 0x4c8   :  { %599 = shalt.err (!%p596_p4)
}
 0x4c9   :  { %464 = dma.vmem_to_hbm [thread:$0]  %s462_s25, 32, %s783_s7, [#allocation3]  }
 0x4ca   :  { %357 = vrot.lane.b32.xlu1 %v352_v51, %s633_s18  ;;  %s639_s29 = smov [#allocation4]  }
 0x4cb   :  { %s471_s30 = sshll.u32 %s639_s29, 4  ;;  %s472_s30 = int_to_ptr.vmem [resolvable:$true] %s471_s30 }
 0x4cc   :  { %s608_s1 = scalar_lea.vmem %s472_s30, 32  ;;  %p613_p6 = scmp.lt.s32.totalorder %s472_s30, %s472_s30 }
 0x4cd   :  { %p609_p5 = scmp.ne.s32.totalorder %s472_s30, %s608_s1  ;;  %p614_p7 = scmp.lt.s32.totalorder %s608_s1, %s608_s1 }
 0x4cf   :  { %p615_p8 = por %p614_p7, %p613_p6 }
 0x4d1   :  { %p616_p9 = pnand %p615_p8, %p609_p5 }
 0x538   :  { %v452_v62 = vpop.permute.xlu1 %451 }
 0x539   :  { %454 = vst.msk [vmem:[#allocation4] sm:$0x3] %vm448_vm6, %v452_v62 }
 0x53a   :  { %619 = shalt.err (!%p616_p9)
}
 0x53b   :  { %474 = dma.vmem_to_hbm [thread:$0]  %s472_s30, 32, %s784_s8, [#allocation5]  }
 0x53c   :  { %v358_v63 = vpop.permute.xlu1 %357 }
 0x53d   :  { %363 = vst.msk [vmem:[%s785_s9 + $0x8] sm:$0xff] %vm361_vm5, %v358_v63 }
 0x53e   :  { %628 = dma.done.wait [#allocation3], 32  }
 0x53f   :  { %629 = vsyncadd [#allocation3], 4294967264 }
 0x540   :  { %630 = dma.done.wait [#allocation5], 32  }
 0x541   :  { %631 = vsyncadd [#allocation5], 4294967264 }
 0x542   :  { %485 = vsyncpa [#allocation3], 1 }
 0x543   :  { %486 = vsyncpa [#allocation5], 1 }

</bundles_post_ra>
